<compile_context>
chip_gen: v6e
topology: v6e:2x2x1
jax: 0.10.0
libtpu: 0.0.40
codegen_flags: <defaults>
</compile_context>

<pallas_src>
import math

import jax
import jax.numpy as jnp
import numpy as np
from jax.experimental import pallas as pl
from jax.experimental.pallas import tpu as pltpu

FREQ_DIM = 256          # frequency_embedding_size
HIDDEN = 32             # hidden_size (small, per module)
MAX_PERIOD = 10000.0
LANE = 128              # TPU lane width


def _round_up(x, m):
    return ((x + m - 1) // m) * m


def _time_embedding_kernel(t_ref, trig_ref, w1_ref, w2_ref, bias_ref, o_ref):
    # t_ref:    (tile, 1)       f32  timesteps (streamed per grid step)
    # trig_ref: (2, FREQ_DIM)   f32  row 0 = freqs repeated over both halves,
    #                                row 1 = phase (pi/2 for cos half, 0 for sin half)
    # w1_ref:   (FREQ_DIM, HP)  f32  first linear weight (resident)
    # w2_ref:   (HP, HP)        f32  second linear weight (resident)
    # bias_ref: (2, HP)         f32  row 0 = b1, row 1 = b2 (resident)
    # o_ref:    (tile, HP)      f32
    t = t_ref[...]                                        # (tile, 1)
    freqs = trig_ref[0:1, :]                              # (1, FREQ_DIM)
    phase = trig_ref[1:2, :]                              # (1, FREQ_DIM)

    # cos(x) = sin(x + pi/2): a single sin covers the cat([cos, sin], -1) layout.
    emb = jnp.sin(t * freqs + phase)                      # (tile, FREQ_DIM) f32

    # MLP: Linear -> SiLU -> Linear.  f32 operands + f32 accumulation — the MXU has huge
    # slack here, so skipping bf16 casts costs nothing and keeps full fidelity.
    h = jnp.dot(emb, w1_ref[...],
                preferred_element_type=jnp.float32) + bias_ref[0:1, :]   # (tile, HP)
    h = h * jax.nn.sigmoid(h)                             # SiLU (VPU + EUP)
    out = jnp.dot(h, w2_ref[...],
                  preferred_element_type=jnp.float32) + bias_ref[1:2, :]
    o_ref[...] = out.astype(o_ref.dtype)


def time_embedding_pallas(t, w1, b1, w2, b2, *, row_tile=1024):
    """t: scalar or (N,). w1: (256,H), b1: (1,H) or (H,), w2: (H,H), b2: (1,H) or (H,).
    Returns (N, H) float32 matching the PyTorch module's forward."""
    t = jnp.asarray(t, dtype=jnp.float32)
    if t.ndim == 0:
        t = t[None]
    n = int(t.shape[0])
    h_out = int(w2.shape[1])
    h_pad = _round_up(max(h_out, LANE), LANE)             # lane-dense (=128) features

    # Row tiling: single padded tile for small N; otherwise split into EQUAL tiles with an
    # even tile count so the "parallel" row axis balances across v7x's two TensorCores.
    if n <= row_tile:
        num_tiles = 1
        tile = _round_up(max(n, 1), 8)
    else:
        num_tiles = -(-n // row_tile)
        if num_tiles % 2:
            num_tiles += 1                                # even -> balanced on v7x
        tile = _round_up(-(-n // num_tiles), 8)
    n_pad = tile * num_tiles

    # Parameter packing (plain JAX glue; constant-folded under jit).
    w1p = jnp.zeros((FREQ_DIM, h_pad), jnp.float32).at[:, :w1.shape[1]].set(
        jnp.asarray(w1, jnp.float32))
    w2p = jnp.zeros((h_pad, h_pad), jnp.float32).at[:w2.shape[0], :h_out].set(
        jnp.asarray(w2, jnp.float32))
    biases = jnp.zeros((2, h_pad), jnp.float32)
    biases = biases.at[0, :jnp.size(b1)].set(jnp.asarray(b1, jnp.float32).reshape(-1))
    biases = biases.at[1, :jnp.size(b2)].set(jnp.asarray(b2, jnp.float32).reshape(-1))

    # Hoisted sinusoid tables, packed into one resident (2, FREQ_DIM) operand:
    # sin(t*freqs + phase) == concat([cos(t*f), sin(t*f)], -1).
    half = FREQ_DIM // 2
    freqs_half = jnp.exp(-math.log(MAX_PERIOD)
                         * jnp.arange(half, dtype=jnp.float32) / half)
    trig = jnp.stack([
        jnp.concatenate([freqs_half, freqs_half]),
        jnp.concatenate([jnp.full((half,), 0.5 * jnp.pi, jnp.float32),
                         jnp.zeros((half,), jnp.float32)]),
    ])                                                    # (2, FREQ_DIM)

    # Pad timesteps (padded rows are computed and discarded).
    t2 = jnp.zeros((n_pad, 1), jnp.float32).at[:n, 0].set(t)

    # Honest cost hint so XLA can overlap/schedule this small custom call.
    cost = pl.CostEstimate(
        flops=2 * n_pad * (FREQ_DIM * h_pad + h_pad * h_pad),
        transcendentals=n_pad * (FREQ_DIM + h_pad),
        bytes_accessed=4 * (n_pad * (1 + h_pad) + 2 * FREQ_DIM
                            + FREQ_DIM * h_pad + h_pad * h_pad + 2 * h_pad),
    )

    # Only raise the scoped-VMEM limit if row_tile is pushed past a few thousand rows
    # (relevant on v7x: 64 MiB physical, 32 MiB scoped default).
    vmem_limit = None
    if tile > 2048:
        est = 4 * tile * (2 + 2 * h_pad + FREQ_DIM + h_pad) \
            + 4 * (2 * FREQ_DIM + FREQ_DIM * h_pad + h_pad * h_pad + 2 * h_pad)
        vmem_limit = min(2 * est + (8 << 20), 60 << 20)

    out = pl.pallas_call(
        _time_embedding_kernel,
        out_shape=jax.ShapeDtypeStruct((n_pad, h_pad), jnp.float32),
        grid=(num_tiles,),
        in_specs=[
            pl.BlockSpec((tile, 1), lambda i: (i, 0)),          # t, streamed per tile
            pl.BlockSpec((2, FREQ_DIM), lambda i: (0, 0)),      # freqs + phase (resident)
            pl.BlockSpec((FREQ_DIM, h_pad), lambda i: (0, 0)),  # w1 (resident)
            pl.BlockSpec((h_pad, h_pad), lambda i: (0, 0)),     # w2 (resident)
            pl.BlockSpec((2, h_pad), lambda i: (0, 0)),         # b1 + b2 (resident)
        ],
        out_specs=pl.BlockSpec((tile, h_pad), lambda i: (i, 0)),
        compiler_params=pltpu.CompilerParams(
            dimension_semantics=("parallel",) if num_tiles > 1 else ("arbitrary",),
            vmem_limit_bytes=vmem_limit),
        cost_estimate=cost,
    )(t2, trig, w1p, w2p, biases)

    # Module semantics: (N, hidden_size) float32 — padded rows/lanes sliced off.
    return out[:n, :h_out]


def time_embedding_ref(t, w1, b1, w2, b2):
    """Pure-JAX f32 reference mirroring the PyTorch forward exactly."""
    t = jnp.asarray(t, dtype=jnp.float32)
    if t.ndim == 0:
        t = t[None]
    half = FREQ_DIM // 2
    freqs = jnp.exp(-math.log(MAX_PERIOD)
                    * jnp.arange(half, dtype=jnp.float32) / half)
    args = t[:, None] * freqs[None, :]
    emb = jnp.concatenate([jnp.cos(args), jnp.sin(args)], axis=-1)
    hidden = emb @ w1 + jnp.asarray(b1).reshape(-1)
    hidden = hidden * jax.nn.sigmoid(hidden)
    return hidden @ w2 + jnp.asarray(b2).reshape(-1)


if __name__ == "__main__":
    key = jax.random.PRNGKey(0)
    k_t, k_w1, k_b1, k_w2, k_b2, k_t2 = jax.random.split(key, 6)

    # Deterministic synthetic parameters (nn.Linear(256, H) and nn.Linear(H, H)).
    bound1 = 1.0 / math.sqrt(FREQ_DIM)
    bound2 = 1.0 / math.sqrt(HIDDEN)
    w1 = jax.random.uniform(k_w1, (FREQ_DIM, HIDDEN), jnp.float32, -bound1, bound1)
    b1 = jax.random.uniform(k_b1, (1, HIDDEN), jnp.float32, -bound1, bound1)
    w2 = jax.random.uniform(k_w2, (HIDDEN, HIDDEN), jnp.float32, -bound2, bound2)
    b2 = jax.random.uniform(k_b2, (1, HIDDEN), jnp.float32, -bound2, bound2)

    # Small batch of fractional timesteps (module's typical input) — single small tile.
    t_small = jax.random.uniform(k_t, (8,), jnp.float32, 0.0, 1000.0)
    out_small = jax.block_until_ready(time_embedding_pallas(t_small, w1, b1, w2, b2))
    ref_small = time_embedding_ref(t_small, w1, b1, w2, b2)
    # f32 MXU path; tolerance covers TPU default-precision matmul passes.
    np.testing.assert_allclose(np.asarray(out_small), np.asarray(ref_small),
                               rtol=1e-2, atol=1e-2)

    # Medium batch: still a single (row-padded) tile under the 1024-row default.
    t_med = jax.random.uniform(k_t2, (300,), jnp.float32, 0.0, 1000.0)
    out_med = jax.block_until_ready(time_embedding_pallas(t_med, w1, b1, w2, b2))
    ref_med = time_embedding_ref(t_med, w1, b1, w2, b2)
    np.testing.assert_allclose(np.asarray(out_med), np.asarray(ref_med),
                               rtol=1e-2, atol=1e-2)

    # Force the multi-tile path (even, balanced tile count) with a small row_tile override.
    out_grid = jax.block_until_ready(
        time_embedding_pallas(t_med, w1, b1, w2, b2, row_tile=128))
    np.testing.assert_allclose(np.asarray(out_grid), np.asarray(ref_med),
                               rtol=1e-2, atol=1e-2)

    print("KERNEL_OK")
</pallas_src>

<mosaic_0001>
module attributes {stable_mosaic.version = 11 : i64} {
  func.func @_time_embedding_kernel(%arg0: i32, %arg1: memref<8x1xf32, #tpu.memory_space<vmem>>, %arg2: memref<2x256xf32, #tpu.memory_space<vmem>>, %arg3: memref<256x128xf32, #tpu.memory_space<vmem>>, %arg4: memref<128x128xf32, #tpu.memory_space<vmem>>, %arg5: memref<2x128xf32, #tpu.memory_space<vmem>>, %arg6: memref<8x128xf32, #tpu.memory_space<vmem>>) attributes {dimension_semantics = [#tpu.dimension_semantics<arbitrary>], iteration_bounds = array<i64: 1>, scalar_prefetch = 0 : i64, scratch_operands = 0 : i64, tpu.core_type = #tpu.core_type<tc>, window_params = [{transform_indices = @transform_0, window_bounds = array<i64: 8, 1>}, {pipeline_mode = #tpu.pipeline_mode<synchronous>, transform_indices = @transform_1, window_bounds = array<i64: 2, 256>}, {pipeline_mode = #tpu.pipeline_mode<synchronous>, transform_indices = @transform_2, window_bounds = array<i64: 256, 128>}, {pipeline_mode = #tpu.pipeline_mode<synchronous>, transform_indices = @transform_3, window_bounds = array<i64: 128, 128>}, {pipeline_mode = #tpu.pipeline_mode<synchronous>, transform_indices = @transform_4, window_bounds = array<i64: 2, 128>}, {transform_indices = @transform_5, window_bounds = array<i64: 8, 128>}]} {
    %c0 = arith.constant 0 : index
    %c0_0 = arith.constant 0 : index
    %0 = vector.load %arg1[%c0, %c0_0] : memref<8x1xf32, #tpu.memory_space<vmem>>, vector<8x1xf32>
    %c0_1 = arith.constant 0 : index
    %c0_2 = arith.constant 0 : index
    %1 = vector.load %arg2[%c0_1, %c0_2] : memref<2x256xf32, #tpu.memory_space<vmem>>, vector<1x256xf32>
    %c1 = arith.constant 1 : index
    %c0_3 = arith.constant 0 : index
    %2 = vector.load %arg2[%c1, %c0_3] : memref<2x256xf32, #tpu.memory_space<vmem>>, vector<1x256xf32>
    %3 = vector.broadcast %0 : vector<8x1xf32> to vector<8x256xf32>
    %4 = vector.broadcast %1 : vector<1x256xf32> to vector<8x256xf32>
    %5 = arith.mulf %3, %4 : vector<8x256xf32>
    %6 = vector.broadcast %2 : vector<1x256xf32> to vector<8x256xf32>
    %7 = arith.addf %5, %6 : vector<8x256xf32>
    %8 = math.sin %7 : vector<8x256xf32>
    %c0_4 = arith.constant 0 : index
    %c0_5 = arith.constant 0 : index
    %9 = vector.load %arg3[%c0_4, %c0_5] : memref<256x128xf32, #tpu.memory_space<vmem>>, vector<256x128xf32>
    %cst = arith.constant dense<0.000000e+00> : vector<8x128xf32>
    %10 = tpu.matmul %8, %9, %cst {dimension_numbers = #tpu.dot_dimension_numbers<[1], [0], [0], [1], [0, 0, 1, 1], [], []>} : vector<8x256xf32>, vector<256x128xf32>, vector<8x128xf32> -> vector<8x128xf32>
    %c0_6 = arith.constant 0 : index
    %c0_7 = arith.constant 0 : index
    %11 = vector.load %arg5[%c0_6, %c0_7] : memref<2x128xf32, #tpu.memory_space<vmem>>, vector<1x128xf32>
    %12 = vector.broadcast %11 : vector<1x128xf32> to vector<8x128xf32>
    %13 = arith.addf %10, %12 : vector<8x128xf32>
    %14 = arith.negf %13 : vector<8x128xf32>
    %15 = math.exp %14 : vector<8x128xf32>
    %cst_8 = arith.constant 1.000000e+00 : f32
    %16 = vector.broadcast %cst_8 : f32 to vector<8x128xf32>
    %17 = arith.addf %16, %15 : vector<8x128xf32>
    %18 = arith.divf %16, %17 : vector<8x128xf32>
    %19 = arith.mulf %13, %18 : vector<8x128xf32>
    %c0_9 = arith.constant 0 : index
    %c0_10 = arith.constant 0 : index
    %20 = vector.load %arg4[%c0_9, %c0_10] : memref<128x128xf32, #tpu.memory_space<vmem>>, vector<128x128xf32>
    %cst_11 = arith.constant dense<0.000000e+00> : vector<8x128xf32>
    %21 = tpu.matmul %19, %20, %cst_11 {dimension_numbers = #tpu.dot_dimension_numbers<[1], [0], [0], [1], [0, 0, 1, 1], [], []>} : vector<8x128xf32>, vector<128x128xf32>, vector<8x128xf32> -> vector<8x128xf32>
    %c1_12 = arith.constant 1 : index
    %c0_13 = arith.constant 0 : index
    %22 = vector.load %arg5[%c1_12, %c0_13] : memref<2x128xf32, #tpu.memory_space<vmem>>, vector<1x128xf32>
    %23 = vector.broadcast %22 : vector<1x128xf32> to vector<8x128xf32>
    %24 = arith.addf %21, %23 : vector<8x128xf32>
    %c0_14 = arith.constant 0 : index
    %c0_15 = arith.constant 0 : index
    %25 = vector.load %arg6[%c0_14, %c0_15] : memref<8x128xf32, #tpu.memory_space<vmem>>, vector<8x128xf32>
    tpu.vector_store %arg6[%c0_14, %c0_15], %24 {strides = array<i32>} : memref<8x128xf32, #tpu.memory_space<vmem>>, vector<8x128xf32>,
    return
  }
  func.func @transform_0(%arg0: i32) -> (i32, i32) {
    %c0_i32 = arith.constant 0 : i32
    %c0_i32_0 = arith.constant 0 : i32
    return %arg0, %c0_i32 : i32, i32
  }
  func.func @transform_1(%arg0: i32) -> (i32, i32) {
    %c0_i32 = arith.constant 0 : i32
    %c0_i32_0 = arith.constant 0 : i32
    %c0_i32_1 = arith.constant 0 : i32
    return %c0_i32, %c0_i32_0 : i32, i32
  }
  func.func @transform_2(%arg0: i32) -> (i32, i32) {
    %c0_i32 = arith.constant 0 : i32
    %c0_i32_0 = arith.constant 0 : i32
    %c0_i32_1 = arith.constant 0 : i32
    return %c0_i32, %c0_i32_0 : i32, i32
  }
  func.func @transform_3(%arg0: i32) -> (i32, i32) {
    %c0_i32 = arith.constant 0 : i32
    %c0_i32_0 = arith.constant 0 : i32
    %c0_i32_1 = arith.constant 0 : i32
    return %c0_i32, %c0_i32_0 : i32, i32
  }
  func.func @transform_4(%arg0: i32) -> (i32, i32) {
    %c0_i32 = arith.constant 0 : i32
    %c0_i32_0 = arith.constant 0 : i32
    %c0_i32_1 = arith.constant 0 : i32
    return %c0_i32, %c0_i32_0 : i32, i32
  }
  func.func @transform_5(%arg0: i32) -> (i32, i32) {
    %c0_i32 = arith.constant 0 : i32
    %c0_i32_0 = arith.constant 0 : i32
    return %arg0, %c0_i32 : i32, i32
  }
}

</mosaic_0001>

<bundles_post_ra>
// kernel: tpu_custom_call.1
= control target key start
LH: loop header
LB: loop body
LE: loop exit
PB: predicated region body
PF: predicated region fallthrough
CT: control target
= control target key end

     0   :  { %10 = vsyncpa [#allocation3], 0  ;;  %s852_s0 = inlined_call_operand.vmem [shape: f32[8,1], index: 0, kind: input, shape index: {}]   ;;  %s853_s1 = inlined_call_operand.vmem [shape: f32[2,256], index: 1, kind: input, shape index: {}]   ;;  %s854_s2 = inlined_call_operand.hbm [shape: f32[256,128], index: 2, kind: input, shape index: {}]   ;;  %s855_s3 = inlined_call_operand.hbm [shape: f32[128,128], index: 3, kind: input, shape index: {}]   ;;  %s856_s4 = inlined_call_operand.vmem [shape: f32[2,128], index: 4, kind: input, shape index: {}]   ;;  %s857_s5 = inlined_call_operand.hbm [shape: f32[8,128], index: 5, kind: output, shape index: {}]  }
   0x1   :  { %11 = vsyncpa [#allocation6], 0 }
   0x2   :  { %12 = vsyncpa [#allocation4], 0  ;;  %s714_s18 = smov [#allocation2]  }
   0x3   :  { %s22_s19 = sshll.u32 %s714_s18, 4  ;;  %s23_s19 = int_to_ptr.vmem [resolvable:$true] %s22_s19 }
   0x4   :  { %s656_s20 = scalar_lea.vmem %s23_s19, 4096  ;;  %p661_p1 = scmp.lt.s32.totalorder %s23_s19, %s23_s19 }
   0x5   :  { %p657_p0 = scmp.ne.s32.totalorder %s23_s19, %s656_s20  ;;  %p662_p2 = scmp.lt.s32.totalorder %s656_s20, %s656_s20 }
   0x7   :  { %p663_p3 = por %p662_p2, %p661_p1 }
   0x9   :  { %p664_p4 = pnand %p663_p3, %p657_p0 }
   0xb   :  { %667 = shalt.err (!%p664_p4)
}
   0xc   :  { %s715_s21 = smov 128   ;;  %s716_s22 = smov 8  }
   0xd   :  { %28 = dma.hbm_to_vmem [thread:$0]  %s854_s2, 4096, %s23_s19, [#allocation3], %s715_s21, %s715_s21, %s716_s22  }
   0xe   :  { %s717_s25 = smov [#allocation5]  }
   0xf   :  { %s34_s26 = sshll.u32 %s717_s25, 4  ;;  %s35_s26 = int_to_ptr.vmem [resolvable:$true] %s34_s26 }
  0x10   :  { %s676_s27 = scalar_lea.vmem %s35_s26, 2048  ;;  %p681_p6 = scmp.lt.s32.totalorder %s35_s26, %s35_s26 }
  0x11   :  { %p677_p5 = scmp.ne.s32.totalorder %s35_s26, %s676_s27  ;;  %p682_p7 = scmp.lt.s32.totalorder %s676_s27, %s676_s27 }
  0x13   :  { %p683_p8 = por %p682_p7, %p681_p6 }
  0x15   :  { %p684_p9 = pnand %p683_p8, %p677_p5 }
  0x17   :  { %687 = shalt.err (!%p684_p9)
}
  0x18   :  { %40 = dma.hbm_to_vmem [thread:$0]  %s855_s3, 2048, %s35_s26, [#allocation6], %s715_s21, %s715_s21, %s716_s22  }
  0x19   :  { %708 = dma.done.wait [#allocation3], 4096  }
  0x1a   :  { %709 = vsyncadd [#allocation3], 4294963200 }
  0x1b   :  { %710 = dma.done.wait [#allocation6], 2048  }
  0x1c   :  { %711 = vsyncadd [#allocation6], 4294965248  ;;  %v718_v0 = vmov 0   ;;  %v49_v1 = vld [vmem:[%s852_s0] sm:$0xff]  ;;  %v323_v2 = vld [vmem:[#allocation2 + $0xf8] sm:$0xff]  ;;  %v59_v34 = vlaneseq  ;;  %s727_s11 = smov [#allocation7]  }
  0x1d   :  { %635 = vset.pattern.permute.xlu0 %v718_v0  ;;  %v307_v3 = vld [vmem:[#allocation2 + $0x78] sm:$0xff]  ;;  %v322_v4 = vld [vmem:[#allocation2 + $0xf0] sm:$0xff]  ;;  %526 = vmatprep.subr.mxu0 %v323_v2  ;;  %v321_v6 = vld [vmem:[#allocation2 + $0xe8] sm:$0xff]  ;;  %s504_s12 = sshll.u32 %s727_s11, 4  ;;  %s505_s12 = int_to_ptr.vmem [resolvable:$true] %s504_s12 }
  0x1e   :  { %55 = vperm.xlu0 %635, %v49_v1   ;;  %v306_v5 = vld [vmem:[#allocation2 + $0x70] sm:$0xff]  ;;  %527 = vmatpush3.msra.mxu0 %v307_v3  ;;  %v305_v7 = vld [vmem:[#allocation2 + $0x68] sm:$0xff]  ;;  %v320_v8 = vld [vmem:[#allocation2 + $0xe0] sm:$0xff]  ;;  %v60_v35 = vshrl.u32 %v59_v34, 7  ;;  %s688_s13 = scalar_lea.vmem %s505_s12, 128  ;;  %p693_p11 = scmp.lt.s32.totalorder %s505_s12, %s505_s12 }
  0x1f   :  { %528 = vmatprep.subr.mxu0 %v322_v4  ;;  %v304_v9 = vld [vmem:[#allocation2 + $0x60] sm:$0xff]  ;;  %v319_v10 = vld [vmem:[#allocation2 + $0xd8] sm:$0xff]  ;;  %v318_v12 = vld [vmem:[#allocation2 + $0xd0] sm:$0xff]  ;;  %p689_p10 = scmp.ne.s32.totalorder %s505_s12, %s688_s13  ;;  %p694_p12 = scmp.lt.s32.totalorder %s688_s13, %s688_s13 }
  0x20   :  { %529 = vmatpush3.msra.mxu0 %v306_v5  ;;  %v303_v11 = vld [vmem:[#allocation2 + $0x58] sm:$0xff]  ;;  %v302_v13 = vld [vmem:[#allocation2 + $0x50] sm:$0xff]  ;;  %v317_v14 = vld [vmem:[#allocation2 + $0xc8] sm:$0xff]  ;;  %v61_v36 = vsub.s32 0, %v60_v35  ;;  %v65_v37 = vsub.s32 1, %v60_v35 }
  0x21   :  { %530 = vmatprep.subr.mxu0 %v321_v6  ;;  %v301_v15 = vld [vmem:[#allocation2 + $0x48] sm:$0xff]  ;;  %v316_v16 = vld [vmem:[#allocation2 + $0xc0] sm:$0xff]  ;;  %v315_v18 = vld [vmem:[#allocation2 + $0xb8] sm:$0xff]  ;;  %p695_p13 = por %p694_p12, %p693_p11 }
  0x22   :  { %531 = vmatpush3.msra.mxu0 %v305_v7  ;;  %v300_v17 = vld [vmem:[#allocation2 + $0x40] sm:$0xff]  ;;  %v299_v19 = vld [vmem:[#allocation2 + $0x38] sm:$0xff]  ;;  %v314_v20 = vld [vmem:[#allocation2 + $0xb0] sm:$0xff] }
  0x23   :  { %532 = vmatprep.subr.mxu0 %v320_v8  ;;  %v298_v21 = vld [vmem:[#allocation2 + $0x30] sm:$0xff]  ;;  %v313_v22 = vld [vmem:[#allocation2 + $0xa8] sm:$0xff]  ;;  %v312_v24 = vld [vmem:[#allocation2 + $0xa0] sm:$0xff]  ;;  %v719_v8 = vmov 2102212464   ;;  %p696_p0 = pnand %p695_p13, %p689_p10 }
  0x24   :  { %533 = vmatpush3.msra.mxu0 %v304_v9  ;;  %v297_v23 = vld [vmem:[#allocation2 + $0x28] sm:$0xff]  ;;  %v296_v25 = vld [vmem:[#allocation2 + $0x20] sm:$0xff]  ;;  %v311_v26 = vld [vmem:[#allocation2 + $0x98] sm:$0xff] }
  0x25   :  { %534 = vmatprep.subr.mxu0 %v319_v10  ;;  %v295_v27 = vld [vmem:[#allocation2 + $0x18] sm:$0xff]  ;;  %v310_v28 = vld [vmem:[#allocation2 + $0x90] sm:$0xff]  ;;  %v309_v30 = vld [vmem:[#allocation2 + $0x88] sm:$0xff]  ;;  %v720_v10 = vmov 920167782  }
  0x26   :  { %535 = vmatpush3.msra.mxu0 %v303_v11  ;;  %v294_v29 = vld [vmem:[#allocation2 + $0x10] sm:$0xff]  ;;  %v293_v31 = vld [vmem:[#allocation2 + $0x8] sm:$0xff]  ;;  %v308_v32 = vld [vmem:[#allocation2 + $0x80] sm:$0xff] }
  0x27   :  { %536 = vmatprep.subr.mxu0 %v318_v12  ;;  %v292_v33 = vld [vmem:[#allocation2] sm:$0xff] }
  0x28   :  { %537 = vmatpush3.msra.mxu0 %v302_v13  ;;  %v50_v38 = vld [vmem:[%s853_s1] ss:$2 sm:$0x3]  ;;  %v514_v39 = vld [vmem:[%s853_s1 + $0x1] ss:$2 sm:$0x3] }
  0x29   :  { %538 = vmatprep.subr.mxu0 %v317_v14  ;;  %v62_v40 = vrot.slane %v50_v38, %v61_v36  ;;  %v66_v41 = vrot.slane %v50_v38, %v65_v37  ;;  %v75_v42 = vrot.slane %v514_v39, %v61_v36  ;;  %v79_v43 = vrot.slane %v514_v39, %v65_v37 }
  0x2a   :  { %539 = vmatpush3.msra.mxu0 %v301_v15  ;;  %v721_v13 = vmov 683565275  }
  0x2b   :  { %540 = vmatprep.subr.mxu0 %v316_v16  ;;  %v722_v16 = vmov 1326507024  }
  0x2c   :  { %541 = vmatpush3.msra.mxu0 %v300_v17 }
  0x2d   :  { %542 = vmatprep.subr.mxu0 %v315_v18  ;;  %v723_v18 = vmov 2475754826  }
  0x2e   :  { %543 = vmatpush3.msra.mxu0 %v299_v19 }
  0x2f   :  { %544 = vmatprep.subr.mxu0 %v314_v20  ;;  %v724_v20 = vmov 2131351028  }
  0x30   :  { %545 = vmatpush3.msra.mxu0 %v298_v21 }
  0x31   :  { %546 = vmatprep.subr.mxu0 %v313_v22 }
  0x32   :  { %547 = vmatpush3.msra.mxu0 %v297_v23 }
  0x33   :  { %548 = vmatprep.subr.mxu0 %v312_v24 }
  0x34   :  { %549 = vmatpush3.msra.mxu0 %v296_v25 }
  0x35   :  { %550 = vmatprep.subr.mxu0 %v311_v26 }
  0x36   :  { %551 = vmatpush3.msra.mxu0 %v295_v27 }
  0x37   :  { %552 = vmatprep.subr.mxu0 %v310_v28 }
  0x38   :  { %553 = vmatpush3.msra.mxu0 %v294_v29 }
  0x39   :  { %554 = vmatprep.subr.mxu0 %v309_v30 }
  0x3a   :  { %555 = vmatpush3.msra.mxu0 %v293_v31 }
  0x3b   :  { %556 = vmatprep.subr.mxu0 %v308_v32 }
  0x3c   :  { %557 = vmatpush3.msra.mxu0 %v292_v33 }
  0x99   :  { %v56_v44 = vpop.permute.xlu0 %55 }
  0x9a   :  { %v69_v45 = vmul.f32 %v62_v40, %v56_v44  ;;  %v70_v46 = vmul.f32 %v66_v41, %v56_v44 }
  0x9c   :  { %v773_v47 = vadd.f32 %v75_v42, %v69_v45  ;;  %v775_v48 = vadd.f32 %v79_v43, %v70_v46 }
  0x9e   :  { %v87_v49 = vand.u32 2139095040, %v773_v47  ;;  %v191_v50 = vand.u32 2139095040, %v775_v48  ;;  %v188_v51 = vand.u32 2147483647, %v775_v48  ;;  %v84_v52 = vand.u32 2147483647, %v773_v47 }
  0x9f   :  { %vm190_vm14 = vcmp.lt.s32.totalorder %v775_v48, 0 }
  0xa0   :  { %v88_v53 = vshrl.u32 %v87_v49, 23  ;;  %v192_v54 = vshrl.u32 %v191_v50, 23  ;;  %v195_v55 = vand.u32 8388607, %v188_v51  ;;  %v91_v58 = vand.u32 8388607, %v84_v52 }
  0xa1   :  { %vm189_vm15 = vcmp.le.f32.partialorder %v188_v51, 0.7853982 }
  0xa2   :  { %v515_v56 = vadd.s32 4294967169, %v88_v53  ;;  %v519_v57 = vadd.s32 4294967169, %v192_v54  ;;  %v196_v61 = vor.u32 8388608, %v195_v55  ;;  %v92_v62 = vor.u32 8388608, %v91_v58 }
  0xa4   :  { %v94_v59 = vadd.s32 1, %v515_v56  ;;  %v198_v60 = vadd.s32 1, %v519_v57  ;;  %v785_v3 = vshll.u32 %v196_v61, 8  ;;  %v789_v7 = vshll.u32 %v92_v62, 8 }
  0xa6   :  { %vm95_vm0 = vcmp.gt.s32.totalorder %v94_v59, 0  ;;  %vm199_vm1 = vcmp.gt.s32.totalorder %v198_v60, 0 }
  0xa7   :  { %v96_v63 = vsel %vm95_vm0, %v94_v59, 0  ;;  %v200_v0 = vsel %vm199_vm1, %v198_v60, 0  ;;  %vm86_vm0 = vcmp.lt.s32.totalorder %v773_v47, 0  ;;  %vm85_vm1 = vcmp.le.f32.partialorder %v84_v52, 0.7853982 }
  0xa8   :  { %v98_v1 = vand.u32 31, %v96_v63  ;;  %v202_v2 = vand.u32 31, %v200_v0  ;;  %v787_v4 = vshrl.u32 %v96_v63, 5  ;;  %v201_v6 = vshrl.u32 %v200_v0, 5 }
  0xaa   :  { %v99_v5 = vsub.s32 32, %v98_v1  ;;  %v110_v9 = vshll.u32 %v719_v8, %v98_v1  ;;  %v113_v11 = vshll.u32 %v720_v10, %v98_v1  ;;  %v203_v12 = vsub.s32 32, %v202_v2 }
  0xab   :  { %v205_v14 = vshll.u32 %v721_v13, %v202_v2  ;;  %v208_v19 = vshll.u32 %v723_v18, %v202_v2  ;;  %v211_v21 = vshll.u32 %v724_v20, %v202_v2  ;;  %v214_v25 = vshll.u32 %v719_v8, %v202_v2 }
  0xac   :  { %v111_v15 = vshrl.u32 %v720_v10, %v99_v5  ;;  %v114_v17 = vshrl.u32 %v722_v16, %v99_v5  ;;  %v206_v22 = vshrl.u32 %v723_v18, %v203_v12  ;;  %v209_v23 = vshrl.u32 %v724_v20, %v203_v12 }
  0xad   :  { %v212_v24 = vshrl.u32 %v719_v8, %v203_v12  ;;  %v204_v26 = vshrl.u32 %v721_v13, %v203_v12  ;;  %v215_v27 = vshrl.u32 %v720_v10, %v203_v12  ;;  %v217_v28 = vshll.u32 %v720_v10, %v202_v2 }
  0xae   :  { %v218_v29 = vshrl.u32 %v722_v16, %v203_v12  ;;  %v112_v30 = vor.u32 %v111_v15, %v110_v9  ;;  %v207_v31 = vor.u32 %v206_v22, %v205_v14  ;;  %v210_v32 = vor.u32 %v209_v23, %v208_v19 }
  0xaf   :  { %v213_v33 = vor.u32 %v212_v24, %v211_v21  ;;  %v115_v34 = vor.u32 %v114_v17, %v113_v11  ;;  %v216_v35 = vor.u32 %v215_v27, %v214_v25  ;;  %vm220_vm2 = vcmp.lt.s32.totalorder %v201_v6, 1 }
  0xb0   :  { %v219_v36 = vor.u32 %v218_v29, %v217_v28  ;;  %vm119_vm3 = vcmp.lt.s32.totalorder %v787_v4, 4  ;;  %vm222_vm4 = vcmp.lt.s32.totalorder %v201_v6, 3  ;;  %vm223_vm5 = vcmp.lt.s32.totalorder %v201_v6, 4 }
  0xb1   :  { %v224_v37 = vsel %vm220_vm2, %v204_v26, %v207_v31  ;;  %v225_v38 = vsel %vm223_vm5, %v213_v33, 2102212464  ;;  %v228_v39 = vsel %vm220_vm2, %v207_v31, %v210_v32  ;;  %v229_v40 = vsel %vm223_vm5, %v216_v35, 920167782 }
  0xb2   :  { %v232_v41 = vsel %vm220_vm2, %v210_v32, %v213_v33  ;;  %vm221_vm6 = vcmp.lt.s32.totalorder %v201_v6, 2  ;;  %v226_v42 = vsel %vm222_vm4, %v210_v32, %v225_v38  ;;  %v230_v43 = vsel %vm222_vm4, %v213_v33, %v229_v40 }
  0xb3   :  { %v233_v44 = vsel %vm223_vm5, %v219_v36, 1326507024  ;;  %v125_v45 = vsel %vm119_vm3, %v112_v30, 920167782  ;;  %v129_v46 = vsel %vm119_vm3, %v115_v34, 1326507024  ;;  %v231_v49 = vsel %vm221_vm6, %v228_v39, %v230_v43 }
  0xb4   :  { %v234_v50 = vsel %vm222_vm4, %v216_v35, %v233_v44  ;;  %v227_v53 = vsel %vm221_vm6, %v224_v37, %v226_v42  ;;  %v797_v55 = vmul.u32.u64.low %v785_v3, %v231_v49  ;;  %v798_v56 = vmul.u32.u64.high %v785_v3, %v231_v49, %v797_v55 }
  0xb5   :  { %v235_v54 = vsel %vm221_vm6, %v232_v41, %v234_v50  ;;  %v101_v59 = vshll.u32 %v721_v13, %v98_v1  ;;  %v102_v60 = vshrl.u32 %v723_v18, %v99_v5  ;;  %v104_v61 = vshll.u32 %v723_v18, %v98_v1 }
  0xb6   :  { %v801_v57 = vmul.u32.u64.low %v785_v3, %v235_v54  ;;  %v802_v58 = vmul.u32.u64.high %v785_v3, %v235_v54, %v801_v57  ;;  %v105_v62 = vshrl.u32 %v724_v20, %v99_v5  ;;  %v107_v63 = vshll.u32 %v724_v20, %v98_v1 }
  0xb7   :  { %v108_v0 = vshrl.u32 %v719_v8, %v99_v5  ;;  %v243_v2 = vmul.u32 %v785_v3, %v227_v53  ;;  %v100_v6 = vshrl.u32 %v721_v13, %v99_v5  ;;  %v103_v9 = vor.u32 %v102_v60, %v101_v59 }
  0xb8   :  { %vm116_vm7 = vcmp.lt.s32.totalorder %v787_v4, 1  ;;  %v246_v10 = vadd.s32 1, %v798_v56  ;;  %v106_v11 = vor.u32 %v105_v62, %v104_v61  ;;  %vm118_vm8 = vcmp.lt.s32.totalorder %v787_v4, 3 }
  0xb9   :  { %v109_v12 = vor.u32 %v108_v0, %v107_v63  ;;  %vm245_vm9 = vc.u32 %v802_v58, %v797_v55  ;;  %vm117_vm10 = vcmp.lt.s32.totalorder %v787_v4, 2  ;;  %v120_v1 = vsel %vm116_vm7, %v100_v6, %v103_v9 }
  0xba   :  { %v130_v8 = vsel %vm118_vm8, %v112_v30, %v129_v46  ;;  %v247_v3 = vsel %vm245_vm9, %v246_v10, %v798_v56  ;;  %v124_v13 = vsel %vm116_vm7, %v103_v9, %v106_v11  ;;  %v244_v42 = vadd.s32 %v797_v55, %v802_v58 }
  0xbb   :  { %v121_v5 = vsel %vm119_vm3, %v109_v12, 2102212464  ;;  %v126_v14 = vsel %vm118_vm8, %v109_v12, %v125_v45  ;;  %v248_v15 = vadd.s32 %v247_v3, %v243_v2  ;;  %v128_v18 = vsel %vm116_vm7, %v106_v11, %v109_v12 }
  0xbc   :  { %v122_v16 = vsel %vm118_vm8, %v106_v11, %v121_v5  ;;  %v127_v17 = vsel %vm117_vm10, %v124_v13, %v126_v14  ;;  %v131_v19 = vsel %vm117_vm10, %v128_v18, %v130_v8  ;;  %vm280_vm5 = vweird.f32 %v775_v48 }
  0xbd   :  { %v820_v20 = vmul.u32.u64.low %v789_v7, %v127_v17  ;;  %v821_v21 = vmul.u32.u64.high %v789_v7, %v127_v17, %v820_v20  ;;  %v249_v22 = vadd.s32 536870912, %v248_v15  ;;  %v123_v25 = vsel %vm117_vm10, %v120_v1, %v122_v16 }
  0xbe   :  { %v824_v23 = vmul.u32.u64.low %v789_v7, %v131_v19  ;;  %v825_v24 = vmul.u32.u64.high %v789_v7, %v131_v19, %v824_v23  ;;  %v139_v29 = vmul.u32 %v789_v7, %v123_v25  ;;  %vm176_vm9 = vweird.f32 %v773_v47 }
  0xbf   :  { %v250_v26 = vshrl.u32 %v249_v22, 30  ;;  %v142_v27 = vadd.s32 1, %v821_v21  ;;  %vm726_vm10 = vmmov 0  }
  0xc0   :  { %vm141_vm11 = vc.u32 %v825_v24, %v820_v20  ;;  %v140_v62 = vadd.s32 %v820_v20, %v825_v24 }
  0xc1   :  { %v251_v28 = vshll.u32 %v250_v26, 30  ;;  %v143_v4 = vsel %vm141_vm11, %v142_v27, %v821_v21  ;;  %v274_v10 = vsub.s32 4, %v250_v26 }
  0xc2   :  { %v144_v31 = vadd.s32 %v143_v4, %v139_v29 }
  0xc3   :  { %v252_v30 = vsub.s32 %v248_v15, %v251_v28  ;;  %v275_v5 = vsel %vm190_vm14, %v274_v10, %v250_v26  ;;  %v525_v10 = vld [vmem:[%s856_s4 + $0x1] ss:$0 sm:$0xff] }
  0xc4   :  { %v145_v33 = vadd.s32 536870912, %v144_v31  ;;  %v277_v16 = vsel %vm189_vm15, 0, %v275_v5 }
  0xc5   :  { %v254_v32 = vsub.s32 0, %v252_v30  ;;  %v281_v19 = vadd.s32 3, %v277_v16 }
  0xc6   :  { %v146_v35 = vshrl.u32 %v145_v33, 30 }
  0xc7   :  { %v520_v34 = vmin.u32 %v254_v32, %v252_v30  ;;  %v282_v22 = vand.u32 3, %v281_v19 }
  0xc8   :  { %v147_v37 = vshll.u32 %v146_v35, 30  ;;  %v170_v18 = vsub.s32 4, %v146_v35 }
  0xc9   :  { %v256_v36 = vclz %v520_v34  ;;  %vm287_vm2 = vcmp.eq.s32.totalorder %v282_v22, 2  ;;  %vm284_vm3 = vcmp.eq.s32.totalorder %v282_v22, 0  ;;  %vm283_vm4 = vcmp.lt.s32.totalorder %v282_v22, 2 }
  0xca   :  { %v148_v39 = vsub.s32 %v144_v31, %v147_v37  ;;  %v171_v21 = vsel %vm86_vm0, %v170_v18, %v146_v35 }
  0xcb   :  { %v521_v38 = vadd.s32 4294967294, %v256_v36  ;;  %v173_v24 = vsel %vm85_vm1, 0, %v171_v21 }
  0xcc   :  { %v150_v41 = vsub.s32 0, %v148_v39  ;;  %v177_v29 = vadd.s32 3, %v173_v24 }
  0xcd   :  { %vm522_vm12 = vcmp.lt.s32.totalorder %v521_v38, 0 }
  0xce   :  { %v259_v40 = vsel %vm522_vm12, 0, %v521_v38  ;;  %v516_v44 = vmin.u32 %v150_v41, %v148_v39  ;;  %v178_v31 = vand.u32 3, %v177_v29  ;;  %v420_v41 = vld [vmem:[#allocation5 + $0x70] sm:$0xff] }
  0xcf   :  { %v260_v7 = vsub.s32 32, %v259_v40  ;;  %v264_v43 = vsub.s32 4294967266, %v259_v40  ;;  %v261_v45 = vshll.u32 %v252_v30, %v259_v40  ;;  %v725_v40 = vmov 0.0  }
  0xd0   :  { %v152_v50 = vclz %v516_v44  ;;  %vm183_vm6 = vcmp.eq.s32.totalorder %v178_v31, 2  ;;  %vm180_vm7 = vcmp.eq.s32.totalorder %v178_v31, 0  ;;  %vm179_vm8 = vcmp.lt.s32.totalorder %v178_v31, 2  ;;  %578 = vmatprep.subr.mxu1 %v725_v40  ;;  %v415_v44 = vld [vmem:[#allocation5 + $0x48] sm:$0xff]  ;;  %610 = vmatprep.mubr.msk.f32.mxu1 %vm726_vm10, %v725_v40 }
  0xd1   :  { %v262_v46 = vshrl.u32 %v244_v42, %v260_v7  ;;  %v265_v49 = vadd.s32 127, %v264_v43  ;;  %v419_v42 = vld [vmem:[#allocation5 + $0x68] sm:$0xff]  ;;  %v418_v7 = vld [vmem:[#allocation5 + $0x60] sm:$0xff]  ;;  %v417_v43 = vld [vmem:[#allocation5 + $0x58] sm:$0xff] }
  0xd2   :  { %v517_v56 = vadd.s32 4294967294, %v152_v50  ;;  %v411_v50 = vld [vmem:[#allocation5 + $0x28] sm:$0xff] }
  0xd3   :  { %v263_v53 = vor.u32 %v262_v46, %v261_v45  ;;  %v266_v54 = vshll.u32 %v265_v49, 23  ;;  %v414_v45 = vld [vmem:[#allocation5 + $0x40] sm:$0xff]  ;;  %v413_v46 = vld [vmem:[#allocation5 + $0x38] sm:$0xff]  ;;  %v412_v49 = vld [vmem:[#allocation5 + $0x30] sm:$0xff] }
  0xd4   :  { %vm518_vm13 = vcmp.lt.s32.totalorder %v517_v56, 0 }
  0xd5   :  { %v267_v57 = vor.u32 4788187, %v266_v54  ;;  %v270_v60 = vcvt.s32.f32 %v263_v53  ;;  %v155_v61 = vsel %vm518_vm13, 0, %v517_v56  ;;  %v410_v53 = vld [vmem:[#allocation5 + $0x20] sm:$0xff]  ;;  %v409_v54 = vld [vmem:[#allocation5 + $0x18] sm:$0xff]  ;;  %v408_v56 = vld [vmem:[#allocation5 + $0x10] sm:$0xff] }
  0xd6   :  { %v156_v63 = vsub.s32 32, %v155_v61  ;;  %v160_v0 = vsub.s32 4294967266, %v155_v61  ;;  %v157_v58 = vshll.u32 %v148_v39, %v155_v61  ;;  %v523_v61 = vld [vmem:[%s856_s4] ss:$0 sm:$0xff] }
  0xd7   :  { %v268_v59 = vand.u32 2147483647, %v267_v57  ;;  %v407_v57 = vld [vmem:[#allocation5 + $0x8] sm:$0xff] }
  0xd8   :  { %v158_v2 = vshrl.u32 %v140_v62, %v156_v63  ;;  %v161_v6 = vadd.s32 127, %v160_v0 }
  0xd9   :  { %v271_v55 = vmul.f32 %v270_v60, %v268_v59  ;;  %v406_v59 = vld [vmem:[#allocation5] sm:$0xff] }
  0xda   :  { %v159_v11 = vor.u32 %v158_v2, %v157_v58  ;;  %v162_v12 = vshll.u32 %v161_v6, 23 }
  0xdb   :  { %v272_v9 = vxor.u32 2147483648, %v271_v55 }
  0xdc   :  { %v163_v3 = vor.u32 4788187, %v162_v12  ;;  %v166_v14 = vcvt.s32.f32 %v159_v11 }
  0xdd   :  { %v273_v1 = vsel %vm190_vm14, %v272_v9, %v271_v55 }
  0xde   :  { %v276_v8 = vsel %vm189_vm15, %v775_v48, %v273_v1  ;;  %v164_v13 = vand.u32 2147483647, %v163_v3  ;;  %v421_v48 = vld [vmem:[#allocation5 + $0x78] sm:$0xff] }
  0xdf   :  { %636 = vcosq.f32 %v276_v8  ;;  %579 = vmatpush3.msra.mxu1 %v421_v48 }
  0xe0   :  { %638 = vsinq.f32 %v276_v8  ;;  %v167_v15 = vmul.f32 %v166_v14, %v164_v13  ;;  %580 = vmatprep.subr.mxu1 %v725_v40 }
  0xe1   :  { %581 = vmatpush3.msra.mxu1 %v420_v41 }
  0xe2   :  { %v168_v17 = vxor.u32 2147483648, %v167_v15  ;;  %582 = vmatprep.subr.mxu1 %v725_v40 }
  0xe3   :  { %583 = vmatpush3.msra.mxu1 %v419_v42 }
  0xe4   :  { %v169_v51 = vsel %vm86_vm0, %v168_v17, %v167_v15  ;;  %584 = vmatprep.subr.mxu1 %v725_v40 }
  0xe5   :  { %v172_v20 = vsel %vm85_vm1, %v773_v47, %v169_v51  ;;  %585 = vmatpush3.msra.mxu1 %v418_v7  ;;  %v416_v47 = vld [vmem:[#allocation5 + $0x50] sm:$0xff] }
  0xe6   :  { %640 = vcosq.f32 %v172_v20  ;;  %586 = vmatprep.subr.mxu1 %v725_v40 }
  0xe7   :  { %642 = vsinq.f32 %v172_v20  ;;  %587 = vmatpush3.msra.mxu1 %v417_v43 }
  0xe8   :  { %588 = vmatprep.subr.mxu1 %v725_v40 }
  0xe9   :  { %589 = vmatpush3.msra.mxu1 %v416_v47 }
  0xea   :  { %590 = vmatprep.subr.mxu1 %v725_v40 }
  0xeb   :  { %591 = vmatpush3.msra.mxu1 %v415_v44 }
  0xec   :  { %v637_v23 = vpop.eup %636  ;;  %592 = vmatprep.subr.mxu1 %v725_v40 }
  0xed   :  { %v639_v25 = vpop.eup %638  ;;  %v288_v26 = vxor.u32 2147483648, %v637_v23  ;;  %593 = vmatpush3.msra.mxu1 %v414_v45 }
  0xee   :  { %v285_v27 = vxor.u32 2147483648, %v639_v25  ;;  %594 = vmatprep.subr.mxu1 %v725_v40 }
  0xef   :  { %v289_v28 = vsel %vm287_vm2, %v288_v26, %v639_v25  ;;  %595 = vmatpush3.msra.mxu1 %v413_v46 }
  0xf0   :  { %v286_v4 = vsel %vm284_vm3, %v637_v23, %v285_v27  ;;  %596 = vmatprep.subr.mxu1 %v725_v40 }
  0xf1   :  { %v290_v52 = vsel %vm283_vm4, %v286_v4, %v289_v28  ;;  %597 = vmatpush3.msra.mxu1 %v412_v49 }
  0xf2   :  { %v291_v30 = vsel %vm280_vm5, nan, %v290_v52  ;;  %598 = vmatprep.subr.mxu1 %v725_v40 }
  0xf3   :  { %393 = vmatprep.mubr.f32.mxu0 %v291_v30  ;;  %v641_v32 = vpop.eup %640  ;;  %599 = vmatpush3.msra.mxu1 %v411_v50 }
  0xf4   :  { %v643_v33 = vpop.eup %642  ;;  %v184_v34 = vxor.u32 2147483648, %v641_v32  ;;  %600 = vmatprep.subr.mxu1 %v725_v40 }
  0xf5   :  { %v181_v35 = vxor.u32 2147483648, %v643_v33  ;;  %601 = vmatpush3.msra.mxu1 %v410_v53 }
  0xf6   :  { %v185_v36 = vsel %vm183_vm6, %v184_v34, %v643_v33  ;;  %602 = vmatprep.subr.mxu1 %v725_v40 }
  0xf7   :  { %v182_v37 = vsel %vm180_vm7, %v641_v32, %v181_v35  ;;  %603 = vmatpush3.msra.mxu1 %v409_v54 }
  0xf8   :  { %v186_v38 = vsel %vm179_vm8, %v182_v37, %v185_v36  ;;  %604 = vmatprep.subr.mxu1 %v725_v40 }
  0xf9   :  { %v187_v39 = vsel %vm176_vm9, nan, %v186_v38  ;;  %605 = vmatpush3.msra.mxu1 %v408_v56 }
  0xfa   :  { %394 = vmatmul.mubr.f32.vlgmr.msra.gmra.mxu0 %v187_v39  ;;  %606 = vmatprep.subr.mxu1 %v725_v40 }
  0xfb   :  { %607 = vmatpush3.msra.mxu1 %v407_v57 }
  0xfc   :  { %608 = vmatprep.subr.mxu1 %v725_v40 }
  0xfd   :  { %609 = vmatpush3.msra.mxu1 %v406_v59 }
 0x1ba   :  { %v558_v60 = vpop.f32.mrf.mxu0 }
 0x1bc   :  { %v559_v62 = vpop.f32.mrf.mxu0 }
 0x1bd   :  { %v560_v63 = vadd.f32 %v559_v62, %v558_v60 }
 0x1bf   :  { %v396_v0 = vadd.f32 %v560_v63, %v523_v61 }
 0x1c1   :  { %v524_v55 = vmul.f32 -1.442695, %v396_v0 }
 0x1c3   :  { %644 = vpow2.f32 %v524_v55 }
 0x1d0   :  { %v645_v58 = vpop.eup %644 }
 0x1d1   :  { %v402_v2 = vadd.f32 1.0, %v645_v58 }
 0x1d3   :  { %646 = vrcp.f32 %v402_v2 }
 0x1e0   :  { %v647_v6 = vpop.eup %646 }
 0x1e1   :  { %v405_v9 = vmul.f32 %v647_v6, %v396_v0 }
 0x1e3   :  { %611 = vmatmul.mubr.f32.vlgmr.msra.gmra.mxu1 %v405_v9 }
 0x2a3   :  { %v493_v11 = vpop.f32.mrf.mxu1 }
 0x2a4   :  { %v494_v12 = vadd.f32 %v525_v10, %v493_v11 }
 0x2a5   :  { %v612_v1 = vpop.f32.mrf.mxu1 }
 0x2a6   :  { %497 = vst [vmem:[#allocation7] sm:$0xff] %v494_v12 }
 0x2a7   :  { %699 = shalt.err (!%p696_p0)
}
 0x2a8   :  { %507 = dma.vmem_to_hbm [thread:$0]  %s505_s12, 128, %s857_s5, [#allocation4]  }
 0x2a9   :  { %712 = dma.done.wait [#allocation4], 128  }
 0x2aa   :  { %713 = vsyncadd [#allocation4], 4294967168 }
 0x2ab   :  { %511 = vsyncpa [#allocation3], 1 }
 0x2ac   :  { %512 = vsyncpa [#allocation6], 1 }
 0x2ad   :  { %513 = vsyncpa [#allocation4], 1 }

</bundles_post_ra>
